<compile_context>
chip_gen: v6e
topology: v6e:2x2x1
jax: 0.10.0
libtpu: 0.0.40
codegen_flags: <defaults>
</compile_context>

<pallas_src>
import functools

import jax
import jax.numpy as jnp
from jax.experimental import pallas as pl
from jax.experimental.pallas import tpu as pltpu

EPS = 1e-5


def residual_block_kernel(x_ref, masks_ref, w_ref, bn_ref, out_ref, *, count):
    """Fused Conv1d -> BN -> ReLU -> Conv1d -> BN + residual.

    x_ref:     (C, Mp) channel-major activations, batches flattened on the
               lane axis (no halo columns); lanes >= N*L are zero.
    masks_ref: (3, Mp) f32 rows = [left-neighbour-valid, right-neighbour-valid,
               column-valid]; zero on padded lanes.
    w_ref:     (2, C, 3C) flattened conv weights [tap0 | tap1 | tap2].
    bn_ref:    (4, C, 1) f32 BatchNorm params [g1, b1, g2, b2].
    """
    C, Mp = x_ref.shape
    cdt = x_ref.dtype
    inv_count = 1.0 / count

    # Hoisted mask broadcasts (reused below; JAX does not CSE broadcast_in_dim).
    m = masks_ref[...]                                         # (3, Mp) f32
    maskL = jnp.broadcast_to(m[0:1, :], (C, Mp)).astype(cdt)
    maskR = jnp.broadcast_to(m[1:2, :], (C, Mp)).astype(cdt)
    maskV = jnp.broadcast_to(m[2:3, :], (C, Mp))               # f32, for h

    w = w_ref[...]                                             # (2, C, 3C)
    bn = bn_ref[...]                                           # (4, C, 1) f32

    def conv3(src, w_flat):
        # k=3 conv as ONE MXU matmul: stack the (-1, 0, +1) tap views of src
        # on the channel (sublane) axis, contract with (C, 3C) weights.
        # Rolls are XLU lane rotations (non-negative shifts only); batch
        # boundary columns and lane-padding/wrap columns are zeroed by
        # maskL/maskR, so every valid column is exact and every padded column
        # of the conv output is exactly zero (keeps BN statistics clean).
        left = pltpu.roll(src, shift=1, axis=1) * maskL         # src[:, j-1]
        right = pltpu.roll(src, shift=Mp - 1, axis=1) * maskR   # src[:, j+1]
        stacked = jnp.concatenate([left, src, right], axis=0)   # (3C, Mp)
        return jnp.dot(w_flat, stacked, preferred_element_type=jnp.float32)

    def bn_scale_shift(y, g, b):
        # Training-mode BatchNorm1d (biased variance, eps=1e-5) fused to a
        # per-channel scale/shift; padded columns of y are zero, so plain
        # lane-axis sums over Mp divided by the true element count are exact.
        mean = jnp.sum(y, axis=1, keepdims=True) * inv_count             # (C,1)
        mean_sq = jnp.sum(y * y, axis=1, keepdims=True) * inv_count      # (C,1)
        var = jnp.maximum(mean_sq - mean * mean, 0.0)
        scale = g * jax.lax.rsqrt(var + EPS)
        shift = b - mean * scale
        return scale, shift
    # TODO(synk): PyTorch BatchNorm1d also updates running_mean/running_var in
    # training mode; emit mean/var as extra kernel outputs if those are needed.

    x_in = x_ref[...]                                          # (C, Mp) cdt

    # conv1 -> BN1 -> ReLU   (maskV keeps padded lanes zero for conv2 / BN2)
    y1 = conv3(x_in, w[0])                                     # f32
    sc1, sh1 = bn_scale_shift(y1, bn[0], bn[1])
    h = maskV * jnp.maximum(y1 * sc1 + sh1, 0.0)               # f32

    # conv2 -> BN2 -> residual add (full-tile lane-dense f32 store)
    y2 = conv3(h.astype(cdt), w[1])
    sc2, sh2 = bn_scale_shift(y2, bn[2], bn[3])
    out_ref[...] = x_in.astype(jnp.float32) + y2 * sc2 + sh2


def _vmem_limit_bytes():
    """Generation-aware VMEM cap: ~75% of physical (64 MiB on v7x, 128 MiB on
    v5e/v6e), never below 32 MiB nor above 100 MiB."""
    phys = 64 * 1024 * 1024
    try:
        phys = int(getattr(pltpu.get_tpu_info(), "vmem_capacity_bytes", phys))
    except Exception:
        pass
    return int(min(max(phys * 3 // 4, 32 * 1024 * 1024), 100 * 1024 * 1024))


def residual_block(x_ncl, w1, g1, b1, w2, g2, b2, *, compute_dtype=jnp.float32):
    """x_ncl: (N, C, L). w*: (C_out, C_in, 3) PyTorch OIW layout. g*, b*: (C,).

    compute_dtype=jnp.bfloat16 streams activations/weights and feeds the MXU
    in bf16 (halves HBM/VMEM traffic on v6e/v7x); BN math stays f32.
    """
    N, C, L = x_ncl.shape
    M = N * L
    Mp = ((M + 127) // 128) * 128          # lane-dense last dim

    # (N, C, L) -> channel-major (C, N*L) -> zero-pad lanes to Mp.
    # TODO(synk): fuse this transform (and the inverse below) into the kernel
    # via a grid over batches once the tiled two-pass BN path is implemented.
    xT = jnp.transpose(x_ncl, (1, 0, 2)).reshape(C, M)
    xT = jnp.pad(xT, ((0, 0), (0, Mp - M))).astype(compute_dtype)

    # Boundary / validity masks over flattened positions (packed: one input).
    idx = jnp.arange(Mp)
    valid = idx < M
    maskL = valid & (idx % L != 0)          # has a left neighbour in-batch
    maskR = valid & (idx % L != L - 1)      # has a right neighbour in-batch
    masks = jnp.stack([maskL, maskR, valid], axis=0).astype(jnp.float32)

    # Conv weights (C, C, 3) OIW -> (C, 3C) = [tap0 | tap1 | tap2]; both convs
    # packed into one (2, C, 3C) buffer, BN params into one (4, C, 1) buffer.
    def flat_w(w):
        return jnp.concatenate([w[:, :, 0], w[:, :, 1], w[:, :, 2]], axis=1)

    wk = jnp.stack([flat_w(w1), flat_w(w2)], axis=0).astype(compute_dtype)
    bn = jnp.stack([g1, b1, g2, b2], axis=0).reshape(4, C, 1).astype(jnp.float32)

    vmem = pl.BlockSpec(memory_space=pltpu.MemorySpace.VMEM)
    kernel = functools.partial(residual_block_kernel, count=float(M))

    outT = pl.pallas_call(
        kernel,
        out_shape=jax.ShapeDtypeStruct((C, Mp), jnp.float32),
        in_specs=[vmem] * 4,
        out_specs=vmem,
        compiler_params=pltpu.CompilerParams(
            vmem_limit_bytes=_vmem_limit_bytes()),
    )(xT, masks, wk, bn)

    # (C, Mp) -> (N, C, L): drop lane padding, un-flatten, back to NCL.
    return jnp.transpose(outT[:, :M].reshape(C, N, L), (1, 0, 2))


def residual_block_ref(x, w1, g1, b1, w2, g2, b2):
    """Pure-JAX reference mirroring the PyTorch module (NCL layout)."""
    def conv1d(x, w):
        return jax.lax.conv_general_dilated(
            x, w, window_strides=(1,), padding=((1, 1),),
            dimension_numbers=('NCH', 'OIH', 'NCH'))

    def bn(y, g, b):
        mean = y.mean(axis=(0, 2), keepdims=True)
        var = ((y - mean) ** 2).mean(axis=(0, 2), keepdims=True)
        return ((y - mean) * jax.lax.rsqrt(var + EPS)
                * g.reshape(1, -1, 1) + b.reshape(1, -1, 1))

    h = jax.nn.relu(bn(conv1d(x, w1), g1, b1))
    return x + bn(conv1d(h, w2), g2, b2)


if __name__ == "__main__":
    N, C, L = 2, 8, 16      # batch=2, conv_dim=8, sequence length=16
    key = jax.random.PRNGKey(0)
    kx, k1, k2, k3, k4, k5, k6 = jax.random.split(key, 7)

    x = jax.random.normal(kx, (N, C, L), jnp.float32)

    bound = 1.0 / ((C * 3) ** 0.5)   # PyTorch Conv1d default init range
    w1 = jax.random.uniform(k1, (C, C, 3), jnp.float32, -bound, bound)
    w2 = jax.random.uniform(k2, (C, C, 3), jnp.float32, -bound, bound)
    g1 = 1.0 + 0.1 * jax.random.normal(k3, (C,), jnp.float32)
    b1 = 0.1 * jax.random.normal(k4, (C,), jnp.float32)
    g2 = 1.0 + 0.1 * jax.random.normal(k5, (C,), jnp.float32)
    b2 = 0.1 * jax.random.normal(k6, (C,), jnp.float32)

    out = jax.block_until_ready(residual_block(x, w1, g1, b1, w2, g2, b2))

    ref = residual_block_ref(x, w1, g1, b1, w2, g2, b2)
    assert out.shape == (N, C, L)
    err = float(jnp.max(jnp.abs(out - ref)))
    assert jnp.allclose(out, ref, atol=1e-4, rtol=1e-4), f"max abs err {err}"
    print("KERNEL_OK")
</pallas_src>

<mosaic_0001>
module attributes {stable_mosaic.version = 11 : i64} {
  func.func @residual_block_kernel(%arg0: memref<8x128xf32, #tpu.memory_space<vmem>>, %arg1: memref<3x128xf32, #tpu.memory_space<vmem>>, %arg2: memref<2x8x24xf32, #tpu.memory_space<vmem>>, %arg3: memref<4x8x1xf32, #tpu.memory_space<vmem>>, %arg4: memref<8x128xf32, #tpu.memory_space<vmem>>) attributes {dimension_semantics = [], scalar_prefetch = 0 : i64, scratch_operands = 0 : i64, tpu.core_type = #tpu.core_type<tc>} {
    %c0 = arith.constant 0 : index
    %c0_0 = arith.constant 0 : index
    %0 = vector.load %arg1[%c0, %c0_0] : memref<3x128xf32, #tpu.memory_space<vmem>>, vector<3x128xf32>
    %1 = vector.extract_strided_slice %0 {offsets = [0, 0], sizes = [1, 128], strides = [1, 1]} : vector<3x128xf32> to vector<1x128xf32>
    %2 = vector.shape_cast %1 : vector<1x128xf32> to vector<1x128xf32>
    %3 = vector.broadcast %2 : vector<1x128xf32> to vector<8x128xf32>
    %4 = vector.extract_strided_slice %0 {offsets = [1, 0], sizes = [1, 128], strides = [1, 1]} : vector<3x128xf32> to vector<1x128xf32>
    %5 = vector.shape_cast %4 : vector<1x128xf32> to vector<1x128xf32>
    %6 = vector.broadcast %5 : vector<1x128xf32> to vector<8x128xf32>
    %7 = vector.extract_strided_slice %0 {offsets = [2, 0], sizes = [1, 128], strides = [1, 1]} : vector<3x128xf32> to vector<1x128xf32>
    %8 = vector.shape_cast %7 : vector<1x128xf32> to vector<1x128xf32>
    %9 = vector.broadcast %8 : vector<1x128xf32> to vector<8x128xf32>
    %c0_1 = arith.constant 0 : index
    %c0_2 = arith.constant 0 : index
    %c0_3 = arith.constant 0 : index
    %10 = vector.load %arg2[%c0_1, %c0_2, %c0_3] : memref<2x8x24xf32, #tpu.memory_space<vmem>>, vector<2x8x24xf32>
    %c0_4 = arith.constant 0 : index
    %c0_5 = arith.constant 0 : index
    %c0_6 = arith.constant 0 : index
    %11 = vector.load %arg3[%c0_4, %c0_5, %c0_6] : memref<4x8x1xf32, #tpu.memory_space<vmem>>, vector<4x8x1xf32>
    %c0_7 = arith.constant 0 : index
    %c0_8 = arith.constant 0 : index
    %12 = vector.load %arg0[%c0_7, %c0_8] : memref<8x128xf32, #tpu.memory_space<vmem>>, vector<8x128xf32>
    %13 = vector.extract_strided_slice %10 {offsets = [0, 0, 0], sizes = [1, 8, 24], strides = [1, 1, 1]} : vector<2x8x24xf32> to vector<1x8x24xf32>
    %14 = vector.shape_cast %13 : vector<1x8x24xf32> to vector<8x24xf32>
    %c1_i32 = arith.constant 1 : i32
    %15 = tpu.dynamic_rotate %12 by %c1_i32 dim 1 : vector<8x128xf32>, i32 -> vector<8x128xf32>
    %16 = arith.mulf %15, %3 : vector<8x128xf32>
    %c127_i32 = arith.constant 127 : i32
    %17 = tpu.dynamic_rotate %12 by %c127_i32 dim 1 : vector<8x128xf32>, i32 -> vector<8x128xf32>
    %18 = arith.mulf %17, %6 : vector<8x128xf32>
    %19 = tpu.concatenate %16, %12, %18 in 0 : vector<8x128xf32>, vector<8x128xf32>, vector<8x128xf32> -> vector<24x128xf32>
    %cst = arith.constant dense<0.000000e+00> : vector<8x128xf32>
    %20 = tpu.matmul %14, %19, %cst {dimension_numbers = #tpu.dot_dimension_numbers<[1], [0], [0], [1], [0, 0, 1, 1], [], []>} : vector<8x24xf32>, vector<24x128xf32>, vector<8x128xf32> -> vector<8x128xf32>
    %21 = vector.extract_strided_slice %11 {offsets = [0, 0, 0], sizes = [1, 8, 1], strides = [1, 1, 1]} : vector<4x8x1xf32> to vector<1x8x1xf32>
    %22 = vector.shape_cast %21 : vector<1x8x1xf32> to vector<8x1xf32>
    %23 = vector.extract_strided_slice %11 {offsets = [1, 0, 0], sizes = [1, 8, 1], strides = [1, 1, 1]} : vector<4x8x1xf32> to vector<1x8x1xf32>
    %24 = vector.shape_cast %23 : vector<1x8x1xf32> to vector<8x1xf32>
    %cst_9 = arith.constant dense<0.000000e+00> : vector<8xf32>
    %25 = vector.multi_reduction <add>, %20, %cst_9 [1] : vector<8x128xf32> to vector<8xf32>
    %26 = vector.shape_cast %25 : vector<8xf32> to vector<8x1xf32>
    %cst_10 = arith.constant 3.125000e-02 : f32
    %27 = vector.broadcast %cst_10 : f32 to vector<8x1xf32>
    %28 = arith.mulf %26, %27 : vector<8x1xf32>
    %29 = arith.mulf %20, %20 : vector<8x128xf32>
    %cst_11 = arith.constant dense<0.000000e+00> : vector<8xf32>
    %30 = vector.multi_reduction <add>, %29, %cst_11 [1] : vector<8x128xf32> to vector<8xf32>
    %31 = vector.shape_cast %30 : vector<8xf32> to vector<8x1xf32>
    %cst_12 = arith.constant 3.125000e-02 : f32
    %32 = vector.broadcast %cst_12 : f32 to vector<8x1xf32>
    %33 = arith.mulf %31, %32 : vector<8x1xf32>
    %34 = arith.mulf %28, %28 : vector<8x1xf32>
    %35 = arith.subf %33, %34 : vector<8x1xf32>
    %cst_13 = arith.constant 0.000000e+00 : f32
    %36 = vector.broadcast %cst_13 : f32 to vector<8x1xf32>
    %37 = arith.maximumf %35, %36 : vector<8x1xf32>
    %cst_14 = arith.constant 9.99999974E-6 : f32
    %38 = vector.broadcast %cst_14 : f32 to vector<8x1xf32>
    %39 = arith.addf %37, %38 : vector<8x1xf32>
    %40 = math.rsqrt %39 : vector<8x1xf32>
    %41 = arith.mulf %22, %40 : vector<8x1xf32>
    %42 = arith.mulf %28, %41 : vector<8x1xf32>
    %43 = arith.subf %24, %42 : vector<8x1xf32>
    %44 = vector.broadcast %41 : vector<8x1xf32> to vector<8x128xf32>
    %45 = arith.mulf %20, %44 : vector<8x128xf32>
    %46 = vector.broadcast %43 : vector<8x1xf32> to vector<8x128xf32>
    %47 = arith.addf %45, %46 : vector<8x128xf32>
    %cst_15 = arith.constant 0.000000e+00 : f32
    %48 = vector.broadcast %cst_15 : f32 to vector<8x128xf32>
    %49 = arith.maximumf %47, %48 : vector<8x128xf32>
    %50 = arith.mulf %9, %49 : vector<8x128xf32>
    %51 = vector.extract_strided_slice %10 {offsets = [1, 0, 0], sizes = [1, 8, 24], strides = [1, 1, 1]} : vector<2x8x24xf32> to vector<1x8x24xf32>
    %52 = vector.shape_cast %51 : vector<1x8x24xf32> to vector<8x24xf32>
    %c1_i32_16 = arith.constant 1 : i32
    %53 = tpu.dynamic_rotate %50 by %c1_i32_16 dim 1 : vector<8x128xf32>, i32 -> vector<8x128xf32>
    %54 = arith.mulf %53, %3 : vector<8x128xf32>
    %c127_i32_17 = arith.constant 127 : i32
    %55 = tpu.dynamic_rotate %50 by %c127_i32_17 dim 1 : vector<8x128xf32>, i32 -> vector<8x128xf32>
    %56 = arith.mulf %55, %6 : vector<8x128xf32>
    %57 = tpu.concatenate %54, %50, %56 in 0 : vector<8x128xf32>, vector<8x128xf32>, vector<8x128xf32> -> vector<24x128xf32>
    %cst_18 = arith.constant dense<0.000000e+00> : vector<8x128xf32>
    %58 = tpu.matmul %52, %57, %cst_18 {dimension_numbers = #tpu.dot_dimension_numbers<[1], [0], [0], [1], [0, 0, 1, 1], [], []>} : vector<8x24xf32>, vector<24x128xf32>, vector<8x128xf32> -> vector<8x128xf32>
    %59 = vector.extract_strided_slice %11 {offsets = [2, 0, 0], sizes = [1, 8, 1], strides = [1, 1, 1]} : vector<4x8x1xf32> to vector<1x8x1xf32>
    %60 = vector.shape_cast %59 : vector<1x8x1xf32> to vector<8x1xf32>
    %61 = vector.extract_strided_slice %11 {offsets = [3, 0, 0], sizes = [1, 8, 1], strides = [1, 1, 1]} : vector<4x8x1xf32> to vector<1x8x1xf32>
    %62 = vector.shape_cast %61 : vector<1x8x1xf32> to vector<8x1xf32>
    %cst_19 = arith.constant dense<0.000000e+00> : vector<8xf32>
    %63 = vector.multi_reduction <add>, %58, %cst_19 [1] : vector<8x128xf32> to vector<8xf32>
    %64 = vector.shape_cast %63 : vector<8xf32> to vector<8x1xf32>
    %cst_20 = arith.constant 3.125000e-02 : f32
    %65 = vector.broadcast %cst_20 : f32 to vector<8x1xf32>
    %66 = arith.mulf %64, %65 : vector<8x1xf32>
    %67 = arith.mulf %58, %58 : vector<8x128xf32>
    %cst_21 = arith.constant dense<0.000000e+00> : vector<8xf32>
    %68 = vector.multi_reduction <add>, %67, %cst_21 [1] : vector<8x128xf32> to vector<8xf32>
    %69 = vector.shape_cast %68 : vector<8xf32> to vector<8x1xf32>
    %cst_22 = arith.constant 3.125000e-02 : f32
    %70 = vector.broadcast %cst_22 : f32 to vector<8x1xf32>
    %71 = arith.mulf %69, %70 : vector<8x1xf32>
    %72 = arith.mulf %66, %66 : vector<8x1xf32>
    %73 = arith.subf %71, %72 : vector<8x1xf32>
    %cst_23 = arith.constant 0.000000e+00 : f32
    %74 = vector.broadcast %cst_23 : f32 to vector<8x1xf32>
    %75 = arith.maximumf %73, %74 : vector<8x1xf32>
    %cst_24 = arith.constant 9.99999974E-6 : f32
    %76 = vector.broadcast %cst_24 : f32 to vector<8x1xf32>
    %77 = arith.addf %75, %76 : vector<8x1xf32>
    %78 = math.rsqrt %77 : vector<8x1xf32>
    %79 = arith.mulf %60, %78 : vector<8x1xf32>
    %80 = arith.mulf %66, %79 : vector<8x1xf32>
    %81 = arith.subf %62, %80 : vector<8x1xf32>
    %82 = vector.broadcast %79 : vector<8x1xf32> to vector<8x128xf32>
    %83 = arith.mulf %58, %82 : vector<8x128xf32>
    %84 = arith.addf %12, %83 : vector<8x128xf32>
    %85 = vector.broadcast %81 : vector<8x1xf32> to vector<8x128xf32>
    %86 = arith.addf %84, %85 : vector<8x128xf32>
    %c0_25 = arith.constant 0 : index
    %c0_26 = arith.constant 0 : index
    %87 = vector.load %arg4[%c0_25, %c0_26] : memref<8x128xf32, #tpu.memory_space<vmem>>, vector<8x128xf32>
    tpu.vector_store %arg4[%c0_25, %c0_26], %86 {strides = array<i32>} : memref<8x128xf32, #tpu.memory_space<vmem>>, vector<8x128xf32>,
    return
  }
}

</mosaic_0001>

<bundles_post_ra>
// kernel: tpu_custom_call.1
= control target key start
LH: loop header
LB: loop body
LE: loop exit
PB: predicated region body
PF: predicated region fallthrough
CT: control target
= control target key end

     0   :  { %s331_s17 = smov 127   ;;  %v332_v1 = vmov 0.0   ;;  %s409_s0 = inlined_call_operand.vmem [shape: f32[8,128], index: 0, kind: input, shape index: {}]   ;;  %s410_s1 = inlined_call_operand.vmem [shape: f32[3,128], index: 1, kind: input, shape index: {}]   ;;  %s411_s2 = inlined_call_operand.vmem [shape: f32[2,8,24], index: 2, kind: input, shape index: {}]   ;;  %s412_s3 = inlined_call_operand.vmem [shape: f32[4,8,1], index: 3, kind: input, shape index: {}]   ;;  %s413_s4 = inlined_call_operand.hbm [shape: f32[8,128], index: 4, kind: output, shape index: {}]  }
   0x1   :  { %v365_v0 = vld [vmem:[%s409_s0] sm:$0xff]  ;;  %279 = vmatprep.subr.mxu0 %v332_v1 }
   0x2   :  { %41 = vrot.lane.b32.xlu0 %v365_v0, %s331_s17 }
   0x3   :  { %9 = vsyncpa [#allocation3], 0  ;;  %vm333_vm0 = vmmov 0   ;;  %288 = vmatprep.subr.mxu1 %v332_v1  ;;  %s334_s18 = smov 1   ;;  %v19_v2 = vlaneseq  ;;  %v18_v5 = vld [vmem:[%s410_s1] sm:$0x7] }
   0x4   :  { %285 = vmatprep.mubr.msk.f32.mxu0 %vm333_vm0, %v332_v1  ;;  %294 = vmatprep.mubr.msk.f32.mxu1 %vm333_vm0, %v332_v1  ;;  %v31_v13 = vld [vmem:[%s411_s2] sm:$0xff]  ;;  %vm44_vm1 = vcmask 195584   ;;  %v335_v17 = vmov 0   ;;  %v34_v29 = vld [vmem:[%s412_s3 + $0x8] sm:$0xff]  ;;  %v35_v56 = vld [vmem:[%s412_s3 + $0x10] sm:$0xff]  ;;  %s336_s30 = smov [#allocation2]  }
   0x5   :  { %v20_v3 = vshrl.u32 %v19_v2, 7  ;;  %303 = vset.pattern.permute.xlu0 %v335_v17  ;;  %304 = vset.pattern.permute.xlu1 %v335_v17  ;;  %v33_v26 = vld [vmem:[%s412_s3] sm:$0xff]  ;;  %v32_v44 = vld [vmem:[%s411_s2 + $0x8] sm:$0xff]  ;;  %v36_v59 = vld [vmem:[%s412_s3 + $0x18] sm:$0xff]  ;;  %s261_s5 = sshll.u32 %s336_s30, 4  ;;  %s262_s5 = int_to_ptr.vmem [resolvable:$true] %s261_s5 }
   0x6   :  { %38 = vrot.lane.b32.xlu0 %v365_v0, %s334_s18  ;;  %s309_s6 = scalar_lea.vmem %s262_s5, 128  ;;  %p314_p1 = scmp.lt.s32.totalorder %s262_s5, %s262_s5 }
   0x7   :  { %v25_v4 = vsub.s32 1, %v20_v3  ;;  %v21_v7 = vsub.s32 0, %v20_v3  ;;  %v29_v33 = vsub.s32 2, %v20_v3  ;;  %p310_p0 = scmp.ne.s32.totalorder %s262_s5, %s309_s6  ;;  %p315_p2 = scmp.lt.s32.totalorder %s309_s6, %s309_s6 }
   0x9   :  { %v26_v6 = vrot.slane %v18_v5, %v25_v4  ;;  %v22_v10 = vrot.slane %v18_v5, %v21_v7  ;;  %v30_v36 = vrot.slane %v18_v5, %v29_v33  ;;  %p316_p3 = por %p315_p2, %p314_p1 }
   0xb   :  { %p317_p4 = pnand %p316_p3, %p310_p0 }
  0x74   :  { %v42_v8 = vpop.permute.xlu0 %41 }
  0x75   :  { %v43_v9 = vmul.f32 %v42_v8, %v26_v6 }
  0x77   :  { %280 = vmatpush3.msra.mxu0 %v43_v9 }
  0x78   :  { %v39_v11 = vpop.permute.xlu0 %38  ;;  %281 = vmatprep.subr.mxu0 %v332_v1 }
  0x79   :  { %v40_v12 = vmul.f32 %v39_v11, %v22_v10  ;;  %282 = vmatpush3.msra.mxu0 %v365_v0 }
  0x7a   :  { %283 = vmatprep.subr.mxu0 %v332_v1 }
  0x7b   :  { %284 = vmatpush3.msra.mxu0 %v40_v12 }
  0x7c   :  { %286 = vmatmul.mubr.msk.f32.vlgmr.msra.gmra.mxu0 %vm44_vm1, %v31_v13 }
 0x13c   :  { %v114_v14 = vpop.f32.mrf.mxu0 }
 0x13d   :  { %118 = vadd.xlane.f32.xlu1 %v114_v14  ;;  %v121_v16 = vmul.f32 %v114_v14, %v114_v14 }
 0x13e   :  { %v287_v15 = vpop.f32.mrf.mxu0 }
 0x141   :  { %122 = vadd.xlane.f32.xlu1 %v121_v16 }
 0x1c6   :  { %v119_v18 = vpop.xlane.xlu1 %118 }
 0x1c7   :  { %v120_v19 = vmul.f32 0.03125, %v119_v18 }
 0x1c9   :  { %v125_v21 = vmul.f32 %v120_v19, %v120_v19 }
 0x1ca   :  { %v123_v20 = vpop.xlane.xlu1 %122 }
 0x1cb   :  { %v124_v22 = vmul.f32 0.03125, %v123_v20 }
 0x1cd   :  { %v126_v23 = vsub.f32 %v124_v22, %v125_v21 }
 0x1cf   :  { %v127_v24 = vmax.f32 %v126_v23, 0.0 }
 0x1d1   :  { %v128_v25 = vadd.f32 1e-05, %v127_v24 }
 0x1d3   :  { %305 = vrsqrt.f32 %v128_v25 }
 0x1e0   :  { %v306_v27 = vpop.eup %305 }
 0x1e1   :  { %v130_v28 = vmul.f32 %v306_v27, %v33_v26 }
 0x1e3   :  { %135 = vperm.xlu0 %303, %v130_v28   ;;  %v131_v30 = vmul.f32 %v130_v28, %v120_v19 }
 0x1e5   :  { %v132_v31 = vsub.f32 %v34_v29, %v131_v30 }
 0x1e7   :  { %141 = vperm.xlu1 %304, %v132_v31  }
 0x25e   :  { %v136_v32 = vpop.permute.xlu0 %135 }
 0x25f   :  { %v138_v34 = vmul.f32 %v136_v32, %v114_v14 }
 0x262   :  { %v142_v35 = vpop.permute.xlu1 %141 }
 0x263   :  { %v144_v37 = vadd.f32 %v142_v35, %v138_v34 }
 0x265   :  { %v145_v38 = vmax.f32 %v144_v37, 0.0 }
 0x267   :  { %v146_v39 = vmul.f32 %v145_v38, %v30_v36 }
 0x269   :  { %150 = vrot.lane.b32.xlu0 %v146_v39, %s331_s17 }
 0x26d   :  { %147 = vrot.lane.b32.xlu0 %v146_v39, %s334_s18 }
 0x2db   :  { %v151_v40 = vpop.permute.xlu0 %150 }
 0x2dc   :  { %v152_v41 = vmul.f32 %v151_v40, %v26_v6 }
 0x2de   :  { %289 = vmatpush3.msra.mxu1 %v152_v41 }
 0x2df   :  { %290 = vmatprep.subr.mxu1 %v332_v1  ;;  %v148_v42 = vpop.permute.xlu0 %147 }
 0x2e0   :  { %v149_v43 = vmul.f32 %v148_v42, %v22_v10  ;;  %291 = vmatpush3.msra.mxu1 %v146_v39 }
 0x2e1   :  { %292 = vmatprep.subr.mxu1 %v332_v1 }
 0x2e2   :  { %293 = vmatpush3.msra.mxu1 %v149_v43 }
 0x2e3   :  { %295 = vmatmul.mubr.msk.f32.vlgmr.msra.gmra.mxu1 %vm44_vm1, %v32_v44 }
 0x3a3   :  { %v222_v45 = vpop.f32.mrf.mxu1 }
 0x3a4   :  { %226 = vadd.xlane.f32.xlu0 %v222_v45  ;;  %v229_v46 = vmul.f32 %v222_v45, %v222_v45 }
 0x3a5   :  { %v296_v47 = vpop.f32.mrf.mxu1 }
 0x3a6   :  { %230 = vadd.xlane.f32.xlu1 %v229_v46 }
 0x42d   :  { %v227_v48 = vpop.xlane.xlu0 %226 }
 0x42e   :  { %v228_v49 = vmul.f32 0.03125, %v227_v48 }
 0x42f   :  { %v231_v50 = vpop.xlane.xlu1 %230 }
 0x430   :  { %v233_v51 = vmul.f32 %v228_v49, %v228_v49  ;;  %v232_v52 = vmul.f32 0.03125, %v231_v50 }
 0x432   :  { %v234_v53 = vsub.f32 %v232_v52, %v233_v51 }
 0x434   :  { %v235_v54 = vmax.f32 %v234_v53, 0.0 }
 0x436   :  { %v236_v55 = vadd.f32 1e-05, %v235_v54 }
 0x438   :  { %307 = vrsqrt.f32 %v236_v55 }
 0x445   :  { %v308_v57 = vpop.eup %307 }
 0x446   :  { %v238_v58 = vmul.f32 %v308_v57, %v35_v56 }
 0x448   :  { %243 = vperm.xlu0 %303, %v238_v58   ;;  %v239_v60 = vmul.f32 %v238_v58, %v228_v49 }
 0x44a   :  { %v240_v61 = vsub.f32 %v36_v59, %v239_v60 }
 0x44c   :  { %250 = vperm.xlu1 %304, %v240_v61  }
 0x4c3   :  { %v244_v62 = vpop.permute.xlu0 %243 }
 0x4c4   :  { %v246_v63 = vmul.f32 %v244_v62, %v222_v45 }
 0x4c6   :  { %v247_v1 = vadd.f32 %v246_v63, %v365_v0 }
 0x4c7   :  { %v251_v2 = vpop.permute.xlu1 %250 }
 0x4c8   :  { %v253_v3 = vadd.f32 %v251_v2, %v247_v1 }
 0x4ca   :  { %254 = vst [vmem:[#allocation2] sm:$0xff] %v253_v3 }
 0x4cb   :  { %320 = shalt.err (!%p317_p4)
}
 0x4cc   :  { %264 = dma.vmem_to_hbm [thread:$0]  %s262_s5, 128, %s413_s4, [#allocation3]  }
 0x4cd   :  { %329 = dma.done.wait [#allocation3], 128  }
 0x4ce   :  { %330 = vsyncadd [#allocation3], 4294967168 }
 0x4cf   :  { %268 = vsyncpa [#allocation3], 1 }

</bundles_post_ra>
